<compile_context>
chip_gen: v6e
topology: v6e:2x2x1
jax: 0.10.0
libtpu: 0.0.40
codegen_flags: <defaults>
</compile_context>

<pallas_src>
import functools

import jax
import jax.numpy as jnp
from jax.experimental import pallas as pl
from jax.experimental.pallas import tpu as pltpu

_LANE = 128


def _pad_axis(a, axis, mult):
    pad = (-a.shape[axis]) % mult
    if pad == 0:
        return a
    widths = [(0, 0)] * a.ndim
    widths[axis] = (0, pad)
    return jnp.pad(a, widths)


def _vmem_cap_bytes():
    # Leave compiler headroom under the physical cap: ~48 MiB on v7x (64 MiB
    # VMEM/TC), ~104 MiB on v5e/v6e (128 MiB).  Conservative fallback if the
    # query is unavailable.
    try:
        phys = int(pltpu.get_tpu_info().vmem_capacity_bytes)
    except Exception:
        phys = 64 * 2**20
    return max(32 * 2**20, phys * 7 // 8 - (8 << 20))


def _resident_spec(shape):
    # Constant-index blocks never change across the grid -> single buffer
    # (default double-buffering would be pure VMEM waste).
    nd = len(shape)
    return pl.BlockSpec(shape, lambda i: (0,) * nd, pipeline_mode=pl.Buffered(1))


def prepare_encoder_params(w1, b1, w2, b2):
    """Cast + pad the encoder weights once (hoisted out of per-call forward)."""
    w1b = _pad_axis(_pad_axis(jnp.asarray(w1, jnp.bfloat16), 0, _LANE), 1, _LANE)
    w2b = _pad_axis(_pad_axis(jnp.asarray(w2, jnp.bfloat16), 0, _LANE), 1, _LANE)
    b1f = _pad_axis(jnp.asarray(b1, jnp.float32).reshape(1, -1), 1, _LANE)
    b2f = _pad_axis(jnp.asarray(b2, jnp.float32).reshape(1, -1), 1, _LANE)
    d_out = jnp.asarray(w2).shape[1]
    return (w1b, b1f, w2b, b2f, d_out)


# ----------------------------------------------------------------------------
# Kernel 1: encoder forward (batch-tiled)   o = relu(x @ W1 + b1) @ W2 + b2
# ----------------------------------------------------------------------------
def _encoder_kernel(x_ref, w1_ref, b1_ref, w2_ref, b2_ref, o_ref):
    # x arrives as f32 (single HBM read of the original data) and is cast to
    # bf16 in-kernel for the MXU; accumulation stays f32.
    x = x_ref[...].astype(jnp.bfloat16)
    h = jnp.dot(x, w1_ref[...], preferred_element_type=jnp.float32)
    h = jnp.maximum(h + b1_ref[...], 0.0)
    o = jnp.dot(h.astype(jnp.bfloat16), w2_ref[...],
                preferred_element_type=jnp.float32)
    o_ref[...] = (o + b2_ref[...]).astype(o_ref.dtype)


def target_forward(x, params, *, tile_n=256):
    """Pallas implementation of Target.forward (h_target only); bf16 output."""
    w1b, b1f, w2b, b2f, d_out = params
    n = x.shape[0]

    # Zero padding is exact: padded x columns hit padded-zero W1 rows, padded
    # hidden columns hit padded-zero W2 rows, padded output columns are sliced.
    xp = _pad_axis(_pad_axis(jnp.asarray(x, jnp.float32), 1, _LANE), 0, tile_n)
    n_p, d_in_p = xp.shape
    assert d_in_p == w1b.shape[0], "input feature dim mismatch after padding"
    d_hid_p = w1b.shape[1]
    d_out_p = w2b.shape[1]
    grid = (n_p // tile_n,)

    # VMEM budget: single-buffered resident weights/biases + double-buffered
    # x (f32) / out (bf16) tiles + f32 hidden intermediate, with 2x headroom.
    weight_bytes = (w1b.size * 2 + w2b.size * 2 + (b1f.size + b2f.size) * 4)
    tile_bytes = (2 * tile_n * d_in_p * 4        # x, double-buffered, f32
                  + 2 * tile_n * d_out_p * 2     # out, double-buffered, bf16
                  + tile_n * d_hid_p * 4)        # f32 hidden intermediate
    vmem_limit = int(min(_vmem_cap_bytes(),
                         max(16 * 2**20, 2 * (weight_bytes + tile_bytes))))

    flops = 2 * n_p * d_in_p * d_hid_p + 2 * n_p * d_hid_p * d_out_p
    bytes_accessed = (xp.size * 4 + w1b.size * 2 + w2b.size * 2
                      + (b1f.size + b2f.size) * 4 + n_p * d_out_p * 2)

    out = pl.pallas_call(
        _encoder_kernel,
        out_shape=jax.ShapeDtypeStruct((n_p, d_out_p), jnp.bfloat16),
        grid=grid,
        in_specs=[
            # x tile walks the batch; weights/biases stay VMEM-resident.
            pl.BlockSpec((tile_n, d_in_p), lambda i: (i, 0)),
            _resident_spec((d_in_p, d_hid_p)),
            _resident_spec((1, d_hid_p)),
            _resident_spec((d_hid_p, d_out_p)),
            _resident_spec((1, d_out_p)),
        ],
        out_specs=pl.BlockSpec((tile_n, d_out_p), lambda i: (i, 0)),
        compiler_params=pltpu.CompilerParams(
            # Batch tiles are independent -> shard across TensorCores (v7x).
            dimension_semantics=("parallel",),
            vmem_limit_bytes=vmem_limit),
        cost_estimate=pl.CostEstimate(
            flops=flops, transcendentals=0, bytes_accessed=bytes_accessed),
    )(xp, w1b, b1f, w2b, b2f)
    return out[:n, :d_out]


# ----------------------------------------------------------------------------
# Kernel 2: Target.get_loss(z) as a one-pass streaming reduction
#   zn = z / max(||z||, 1e-12)
#   loss = -mean_i ||zn_i - mean(zn)||^2  =  ||mean(zn)||^2 - mean_i ||zn_i||^2
# ----------------------------------------------------------------------------
def _loss_kernel(z_ref, o_ref, sumz_ref, sumsq_ref, *, inv_n):
    @pl.when(pl.program_id(0) == 0)
    def _():
        sumz_ref[...] = jnp.zeros_like(sumz_ref)
        sumsq_ref[...] = jnp.zeros_like(sumsq_ref)

    z = z_ref[...].astype(jnp.float32)
    sq = jnp.sum(z * z, axis=-1, keepdims=True)             # (tile, 1)
    # rsqrt(max(||z||^2, 1e-24)) == 1 / max(||z||, 1e-12); runs on the EUP.
    inv = jax.lax.rsqrt(jnp.maximum(sq, 1e-24))
    zn = z * inv
    sumz_ref[...] += jnp.sum(zn, axis=0, keepdims=True)      # (1, d)
    sumsq_ref[...] += jnp.sum(sq * inv * inv, axis=0, keepdims=True)  # (1, 1)

    @pl.when(pl.program_id(0) == pl.num_programs(0) - 1)
    def _():
        mu = sumz_ref[...] * inv_n                            # (1, d)
        o_ref[...] = (jnp.sum(mu * mu, axis=-1, keepdims=True)
                      - sumsq_ref[...] * inv_n)


def target_get_loss(z, *, tile_n=512):
    n = z.shape[0]
    # Zero row/column padding contributes nothing to either accumulator.
    zp = _pad_axis(_pad_axis(jnp.asarray(z), 1, _LANE), 0, tile_n)
    n_p, d_p = zp.shape
    grid = (n_p // tile_n,)

    itemsize = jnp.dtype(zp.dtype).itemsize
    tile_bytes = 2 * tile_n * d_p * itemsize + (d_p + 1) * 4
    vmem_limit = int(min(_vmem_cap_bytes(), max(16 * 2**20, 4 * tile_bytes)))

    kernel = functools.partial(_loss_kernel, inv_n=1.0 / n)
    out = pl.pallas_call(
        kernel,
        out_shape=jax.ShapeDtypeStruct((1, 1), jnp.float32),
        grid=grid,
        in_specs=[pl.BlockSpec((tile_n, d_p), lambda i: (i, 0))],
        # Scalar (1,1) VMEM output: single masked-lane store once per call,
        # accepted knowingly (negligible vs. the streaming reduction).
        out_specs=pl.BlockSpec((1, 1), lambda i: (0, 0)),
        scratch_shapes=[pltpu.VMEM((1, d_p), jnp.float32),    # sum(zn)
                        pltpu.VMEM((1, 1), jnp.float32)],     # sum(||zn||^2)
        compiler_params=pltpu.CompilerParams(
            # Grid axis carries the accumulators -> arbitrary (reduction).
            dimension_semantics=("arbitrary",),
            vmem_limit_bytes=vmem_limit),
    )(zp)
    return out[0, 0]


# ----------------------------------------------------------------------------
# Kernel 3 (optional fused path): forward + get_loss in one streaming pass.
# Eliminates the full HBM read-back of z when forward and loss always run
# together.  Loss is computed on the bf16-rounded encoder output so it matches
# target_get_loss(target_forward(x)) exactly (modulo accumulation order).
# ----------------------------------------------------------------------------
def _fused_kernel(x_ref, w1_ref, b1_ref, w2_ref, b2_ref, h_ref, loss_ref,
                  sumz_ref, sumsq_ref, *, inv_n, n_valid, tile_n):
    @pl.when(pl.program_id(0) == 0)
    def _():
        sumz_ref[...] = jnp.zeros_like(sumz_ref)
        sumsq_ref[...] = jnp.zeros_like(sumsq_ref)

    x = x_ref[...].astype(jnp.bfloat16)
    h = jnp.dot(x, w1_ref[...], preferred_element_type=jnp.float32)
    h = jnp.maximum(h + b1_ref[...], 0.0)
    o = jnp.dot(h.astype(jnp.bfloat16), w2_ref[...],
                preferred_element_type=jnp.float32) + b2_ref[...]
    z_bf16 = o.astype(jnp.bfloat16)
    h_ref[...] = z_bf16

    # Streaming-loss epilogue.  Padded batch rows (x rows are zero but bias
    # makes o nonzero) must be masked out of the accumulators.
    z = z_bf16.astype(jnp.float32)
    row = (pl.program_id(0) * tile_n
           + jax.lax.broadcasted_iota(jnp.int32, (tile_n, 1), 0))
    valid = row < n_valid
    sq = jnp.sum(z * z, axis=-1, keepdims=True)
    inv = jax.lax.rsqrt(jnp.maximum(sq, 1e-24))
    zn = jnp.where(valid, z * inv, 0.0)
    sumz_ref[...] += jnp.sum(zn, axis=0, keepdims=True)
    sumsq_ref[...] += jnp.sum(jnp.where(valid, sq * inv * inv, 0.0),
                              axis=0, keepdims=True)

    @pl.when(pl.program_id(0) == pl.num_programs(0) - 1)
    def _():
        mu = sumz_ref[...] * inv_n
        loss_ref[...] = (jnp.sum(mu * mu, axis=-1, keepdims=True)
                         - sumsq_ref[...] * inv_n)


def target_forward_and_loss(x, params, *, tile_n=256):
    w1b, b1f, w2b, b2f, d_out = params
    n = x.shape[0]
    xp = _pad_axis(_pad_axis(jnp.asarray(x, jnp.float32), 1, _LANE), 0, tile_n)
    n_p, d_in_p = xp.shape
    assert d_in_p == w1b.shape[0], "input feature dim mismatch after padding"
    d_hid_p = w1b.shape[1]
    d_out_p = w2b.shape[1]
    grid = (n_p // tile_n,)

    weight_bytes = w1b.size * 2 + w2b.size * 2 + (b1f.size + b2f.size) * 4
    tile_bytes = (2 * tile_n * d_in_p * 4 + 2 * tile_n * d_out_p * 2
                  + 2 * tile_n * d_hid_p * 4 + (d_out_p + 1) * 4)
    vmem_limit = int(min(_vmem_cap_bytes(),
                         max(16 * 2**20, 2 * (weight_bytes + tile_bytes))))

    kernel = functools.partial(_fused_kernel, inv_n=1.0 / n, n_valid=n,
                               tile_n=tile_n)
    h, loss = pl.pallas_call(
        kernel,
        out_shape=(jax.ShapeDtypeStruct((n_p, d_out_p), jnp.bfloat16),
                   jax.ShapeDtypeStruct((1, 1), jnp.float32)),
        grid=grid,
        in_specs=[
            pl.BlockSpec((tile_n, d_in_p), lambda i: (i, 0)),
            _resident_spec((d_in_p, d_hid_p)),
            _resident_spec((1, d_hid_p)),
            _resident_spec((d_hid_p, d_out_p)),
            _resident_spec((1, d_out_p)),
        ],
        out_specs=(pl.BlockSpec((tile_n, d_out_p), lambda i: (i, 0)),
                   pl.BlockSpec((1, 1), lambda i: (0, 0))),
        scratch_shapes=[pltpu.VMEM((1, d_out_p), jnp.float32),
                        pltpu.VMEM((1, 1), jnp.float32)],
        compiler_params=pltpu.CompilerParams(
            # Loss accumulators are carried across the grid -> arbitrary.
            dimension_semantics=("arbitrary",),
            vmem_limit_bytes=vmem_limit),
    )(xp, w1b, b1f, w2b, b2f)
    return h[:n, :d_out], loss[0, 0]


# ----------------------------------------------------------------------------
# Pure-JAX references for correctness checks
# ----------------------------------------------------------------------------
def _ref_forward(x, w1, b1, w2, b2):
    xb, w1b, w2b = (jnp.asarray(a, jnp.bfloat16) for a in (x, w1, w2))
    h = jnp.dot(xb, w1b, preferred_element_type=jnp.float32) + b1
    h = jnp.maximum(h, 0.0)
    return jnp.dot(h.astype(jnp.bfloat16), w2b,
                   preferred_element_type=jnp.float32) + b2


def _ref_loss(z):
    z = jnp.asarray(z, jnp.float32)
    zn = z / jnp.maximum(jnp.linalg.norm(z, axis=-1, keepdims=True), 1e-12)
    zc = zn - zn.mean(axis=0, keepdims=True)
    return -jnp.mean(jnp.sum(zc * zc, axis=1))


if __name__ == "__main__":
    # TODO(synk): the original target_encoder architecture is defined outside
    # this module; a deterministic 2-layer MLP stand-in is used for its forward.
    key = jax.random.PRNGKey(0)
    k_x, k_w1, k_b1, k_w2, k_b2 = jax.random.split(key, 5)

    # N deliberately not a tile multiple to exercise batch-padding / masking.
    N, D_IN, D_HID, D_OUT = 200, 128, 256, 128
    x = jax.random.normal(k_x, (N, D_IN), dtype=jnp.float32)
    w1 = jax.random.normal(k_w1, (D_IN, D_HID), dtype=jnp.float32) * 0.1
    b1 = jax.random.normal(k_b1, (1, D_HID), dtype=jnp.float32) * 0.01
    w2 = jax.random.normal(k_w2, (D_HID, D_OUT), dtype=jnp.float32) * 0.1
    b2 = jax.random.normal(k_b2, (1, D_OUT), dtype=jnp.float32) * 0.01

    params = prepare_encoder_params(w1, b1, w2, b2)

    # Separate-kernel path (Target.forward, then Target.get_loss).
    h_target = target_forward(x, params)
    jax.block_until_ready(h_target)
    loss = target_get_loss(h_target)
    jax.block_until_ready(loss)

    # Fused forward + loss path (avoids the HBM read-back of z).
    h_fused, loss_fused = target_forward_and_loss(x, params)
    jax.block_until_ready(h_fused)
    jax.block_until_ready(loss_fused)

    # Verify against pure-JAX references (same bf16-in / f32-accum math; bf16
    # output rounding included in the tolerance).
    h_ref = _ref_forward(x, w1, b1, w2, b2)
    assert jnp.allclose(h_target.astype(jnp.float32), h_ref,
                        atol=6e-2, rtol=6e-2), "forward mismatch"
    assert jnp.allclose(h_fused.astype(jnp.float32), h_ref,
                        atol=6e-2, rtol=6e-2), "fused forward mismatch"

    l_ref = _ref_loss(h_target)
    assert jnp.allclose(loss, l_ref, atol=2e-3, rtol=2e-3), "loss mismatch"
    l_ref_fused = _ref_loss(h_fused)
    assert jnp.allclose(loss_fused, l_ref_fused,
                        atol=2e-3, rtol=2e-3), "fused loss mismatch"

    print("KERNEL_OK")
</pallas_src>

<mosaic_0001>
module attributes {stable_mosaic.version = 11 : i64} {
  func.func @_encoder_kernel(%arg0: i32, %arg1: memref<256x128xf32, #tpu.memory_space<vmem>>, %arg2: memref<128x256xbf16, #tpu.memory_space<vmem>>, %arg3: memref<1x256xf32, #tpu.memory_space<vmem>>, %arg4: memref<256x128xbf16, #tpu.memory_space<vmem>>, %arg5: memref<1x128xf32, #tpu.memory_space<vmem>>, %arg6: memref<256x128xbf16, #tpu.memory_space<vmem>>) attributes {dimension_semantics = [#tpu.dimension_semantics<parallel>], iteration_bounds = array<i64: 1>, scalar_prefetch = 0 : i64, scratch_operands = 0 : i64, tpu.core_type = #tpu.core_type<tc>, window_params = [{transform_indices = @transform_0, window_bounds = array<i64: 256, 128>}, {pipeline_mode = #tpu.pipeline_mode<synchronous>, transform_indices = @transform_1, window_bounds = array<i64: 128, 256>}, {pipeline_mode = #tpu.pipeline_mode<synchronous>, transform_indices = @transform_2, window_bounds = array<i64: 1, 256>}, {pipeline_mode = #tpu.pipeline_mode<synchronous>, transform_indices = @transform_3, window_bounds = array<i64: 256, 128>}, {pipeline_mode = #tpu.pipeline_mode<synchronous>, transform_indices = @transform_4, window_bounds = array<i64: 1, 128>}, {transform_indices = @transform_5, window_bounds = array<i64: 256, 128>}]} {
    %c0 = arith.constant 0 : index
    %c0_0 = arith.constant 0 : index
    %0 = vector.load %arg1[%c0, %c0_0] : memref<256x128xf32, #tpu.memory_space<vmem>>, vector<256x128xf32>
    %1 = arith.truncf %0 : vector<256x128xf32> to vector<256x128xbf16>
    %c0_1 = arith.constant 0 : index
    %c0_2 = arith.constant 0 : index
    %2 = vector.load %arg2[%c0_1, %c0_2] : memref<128x256xbf16, #tpu.memory_space<vmem>>, vector<128x256xbf16>
    %cst = arith.constant dense<0.000000e+00> : vector<256x256xf32>
    %3 = tpu.matmul %1, %2, %cst {dimension_numbers = #tpu.dot_dimension_numbers<[1], [0], [0], [1], [0, 0, 1, 1], [], []>} : vector<256x128xbf16>, vector<128x256xbf16>, vector<256x256xf32> -> vector<256x256xf32>
    %c0_3 = arith.constant 0 : index
    %c0_4 = arith.constant 0 : index
    %4 = vector.load %arg3[%c0_3, %c0_4] : memref<1x256xf32, #tpu.memory_space<vmem>>, vector<1x256xf32>
    %5 = vector.broadcast %4 : vector<1x256xf32> to vector<256x256xf32>
    %6 = arith.addf %3, %5 : vector<256x256xf32>
    %cst_5 = arith.constant 0.000000e+00 : f32
    %7 = vector.broadcast %cst_5 : f32 to vector<256x256xf32>
    %8 = arith.maximumf %6, %7 : vector<256x256xf32>
    %9 = arith.truncf %8 : vector<256x256xf32> to vector<256x256xbf16>
    %c0_6 = arith.constant 0 : index
    %c0_7 = arith.constant 0 : index
    %10 = vector.load %arg4[%c0_6, %c0_7] : memref<256x128xbf16, #tpu.memory_space<vmem>>, vector<256x128xbf16>
    %cst_8 = arith.constant dense<0.000000e+00> : vector<256x128xf32>
    %11 = tpu.matmul %9, %10, %cst_8 {dimension_numbers = #tpu.dot_dimension_numbers<[1], [0], [0], [1], [0, 0, 1, 1], [], []>} : vector<256x256xbf16>, vector<256x128xbf16>, vector<256x128xf32> -> vector<256x128xf32>
    %c0_9 = arith.constant 0 : index
    %c0_10 = arith.constant 0 : index
    %12 = vector.load %arg5[%c0_9, %c0_10] : memref<1x128xf32, #tpu.memory_space<vmem>>, vector<1x128xf32>
    %13 = vector.broadcast %12 : vector<1x128xf32> to vector<256x128xf32>
    %14 = arith.addf %11, %13 : vector<256x128xf32>
    %15 = arith.truncf %14 : vector<256x128xf32> to vector<256x128xbf16>
    %c0_11 = arith.constant 0 : index
    %c0_12 = arith.constant 0 : index
    %16 = vector.load %arg6[%c0_11, %c0_12] : memref<256x128xbf16, #tpu.memory_space<vmem>>, vector<256x128xbf16>
    tpu.vector_store %arg6[%c0_11, %c0_12], %15 {strides = array<i32>} : memref<256x128xbf16, #tpu.memory_space<vmem>>, vector<256x128xbf16>,
    return
  }
  func.func @transform_0(%arg0: i32) -> (i32, i32) {
    %c0_i32 = arith.constant 0 : i32
    %c0_i32_0 = arith.constant 0 : i32
    return %arg0, %c0_i32 : i32, i32
  }
  func.func @transform_1(%arg0: i32) -> (i32, i32) {
    %c0_i32 = arith.constant 0 : i32
    %c0_i32_0 = arith.constant 0 : i32
    %c0_i32_1 = arith.constant 0 : i32
    return %c0_i32, %c0_i32_0 : i32, i32
  }
  func.func @transform_2(%arg0: i32) -> (i32, i32) {
    %c0_i32 = arith.constant 0 : i32
    %c0_i32_0 = arith.constant 0 : i32
    %c0_i32_1 = arith.constant 0 : i32
    return %c0_i32, %c0_i32_0 : i32, i32
  }
  func.func @transform_3(%arg0: i32) -> (i32, i32) {
    %c0_i32 = arith.constant 0 : i32
    %c0_i32_0 = arith.constant 0 : i32
    %c0_i32_1 = arith.constant 0 : i32
    return %c0_i32, %c0_i32_0 : i32, i32
  }
  func.func @transform_4(%arg0: i32) -> (i32, i32) {
    %c0_i32 = arith.constant 0 : i32
    %c0_i32_0 = arith.constant 0 : i32
    %c0_i32_1 = arith.constant 0 : i32
    return %c0_i32, %c0_i32_0 : i32, i32
  }
  func.func @transform_5(%arg0: i32) -> (i32, i32) {
    %c0_i32 = arith.constant 0 : i32
    %c0_i32_0 = arith.constant 0 : i32
    return %arg0, %c0_i32 : i32, i32
  }
}

</mosaic_0001>

<bundles_post_ra>
// kernel: tpu_custom_call.1
= control target key start
LH: loop header
LB: loop body
LE: loop exit
PB: predicated region body
PF: predicated region fallthrough
CT: control target
= control target key end

     0   :  { %10 = vsyncpa [#allocation3], 0  ;;  %s1602_s0 = inlined_call_operand.hbm [shape: f32[256,128], index: 0, kind: input, shape index: {}]   ;;  %s1603_s1 = inlined_call_operand.hbm [shape: bf16[128,256], index: 1, kind: input, shape index: {}]   ;;  %s1604_s2 = inlined_call_operand.vmem [shape: f32[1,256], index: 2, kind: input, shape index: {}]   ;;  %s1605_s3 = inlined_call_operand.hbm [shape: bf16[256,128], index: 3, kind: input, shape index: {}]   ;;  %s1606_s4 = inlined_call_operand.vmem [shape: f32[1,128], index: 4, kind: input, shape index: {}]   ;;  %s1607_s5 = inlined_call_operand.hbm [shape: bf16[256,128], index: 5, kind: output, shape index: {}]  }
   0x1   :  { %11 = vsyncpa [#allocation6], 0 }
   0x2   :  { %12 = vsyncpa [#allocation4], 0  ;;  %s1421_s18 = smov [#allocation5]   ;;  %s1422_s20 = smov [#allocation2]  }
   0x3   :  { %s30_s19 = sshll.u32 %s1421_s18, 4  ;;  %s18_s21 = sshll.u32 %s1422_s20, 4  ;;  %s31_s19 = int_to_ptr.vmem [resolvable:$true] %s30_s19  ;;  %s19_s21 = int_to_ptr.vmem [resolvable:$true] %s18_s21 }
   0x4   :  { %s1343_s22 = scalar_lea.vmem %s31_s19, 2048  ;;  %p1348_p1 = scmp.lt.s32.totalorder %s31_s19, %s31_s19 }
   0x5   :  { %p1344_p0 = scmp.ne.s32.totalorder %s31_s19, %s1343_s22  ;;  %p1349_p2 = scmp.lt.s32.totalorder %s1343_s22, %s1343_s22 }
   0x7   :  { %p1350_p3 = por %p1349_p2, %p1348_p1 }
   0x9   :  { %p1351_p4 = pnand %p1350_p3, %p1344_p0 }
   0xb   :  { %1354 = shalt.err (!%p1351_p4)
}
   0xc   :  { %s1423_s23 = smov 128   ;;  %s1424_s24 = smov 8  }
   0xd   :  { %36 = dma.hbm_to_vmem [thread:$0]  %s1603_s1, 2048, %s31_s19, [#allocation6], %s1423_s23, %s1423_s23, %s1424_s24  }
   0xe   :  { %s1363_s27 = scalar_lea.vmem %s19_s21, 4096  ;;  %p1368_p6 = scmp.lt.s32.totalorder %s19_s21, %s19_s21 }
   0xf   :  { %p1364_p5 = scmp.ne.s32.totalorder %s19_s21, %s1363_s27  ;;  %p1369_p7 = scmp.lt.s32.totalorder %s1363_s27, %s1363_s27 }
  0x11   :  { %p1370_p8 = por %p1369_p7, %p1368_p6 }
  0x13   :  { %p1371_p9 = pnand %p1370_p8, %p1364_p5 }
  0x15   :  { %1374 = shalt.err (!%p1371_p9)
}
  0x16   :  { %24 = dma.hbm_to_vmem [thread:$0]  %s1602_s0, 4096, %s19_s21, [#allocation3], %s1423_s23, %s1423_s23, %s1424_s24  }
  0x17   :  { %s1425_s30 = smov [#allocation7]  }
  0x18   :  { %s44_s6 = sshll.u32 %s1425_s30, 4  ;;  %s45_s6 = int_to_ptr.vmem [resolvable:$true] %s44_s6 }
  0x19   :  { %s1383_s7 = scalar_lea.vmem %s45_s6, 2048  ;;  %p1388_p11 = scmp.lt.s32.totalorder %s45_s6, %s45_s6 }
  0x1a   :  { %p1384_p10 = scmp.ne.s32.totalorder %s45_s6, %s1383_s7  ;;  %p1389_p12 = scmp.lt.s32.totalorder %s1383_s7, %s1383_s7 }
  0x1c   :  { %p1390_p13 = por %p1389_p12, %p1388_p11 }
  0x1e   :  { %p1391_p0 = pnand %p1390_p13, %p1384_p10 }
  0x20   :  { %1394 = shalt.err (!%p1391_p0)
}
  0x21   :  { %s1426_s1 = smov 64   ;;  %s1427_s8 = smov 4  }
  0x22   :  { %50 = dma.hbm_to_vmem [thread:$0]  %s1605_s3, 2048, %s45_s6, [#allocation6], %s1426_s1, %s1426_s1, %s1427_s8  }
  0x23   :  { %1415 = dma.done.wait [#allocation3], 4096  }
  0x24   :  { %1416 = vsyncadd [#allocation3], 4294963200 }
  0x25   :  { %1417 = dma.done.wait [#allocation6], 4096  }
  0x26   :  { %1418 = vsyncadd [#allocation6], 4294963200  ;;  %v1428_v0 = vmov 0   ;;  %v1295_v1 = vld [vmem:[#allocation5 + $0x74] ss:$8 sps:$4 sm:$0xff]   ;;  %v63_v20 = vld [vmem:[#allocation2] sm:$0xff] }
  0x27   :  { %251 = vmatprep.mubr.bf16.mxu0 %v1428_v0  ;;  %v1297_v2 = vld [vmem:[#allocation5 + $0x70] ss:$8 sps:$4 sm:$0xff]   ;;  %219 = vmatprep.subr.bf16.mxu0 %v1295_v1  ;;  %v1298_v3 = vld [vmem:[#allocation5 + $0x64] ss:$8 sps:$4 sm:$0xff]   ;;  %v1300_v4 = vld [vmem:[#allocation5 + $0x60] ss:$8 sps:$4 sm:$0xff]  }
  0x28   :  { %220 = vmatpush1.bf16.msra.mxu0 %v1297_v2  ;;  %v1301_v5 = vld [vmem:[#allocation5 + $0x54] ss:$8 sps:$4 sm:$0xff]   ;;  %v1303_v6 = vld [vmem:[#allocation5 + $0x50] ss:$8 sps:$4 sm:$0xff]   ;;  %v1304_v7 = vld [vmem:[#allocation5 + $0x44] ss:$8 sps:$4 sm:$0xff]  }
  0x29   :  { %221 = vmatprep.subr.bf16.mxu0 %v1298_v3  ;;  %v1306_v8 = vld [vmem:[#allocation5 + $0x40] ss:$8 sps:$4 sm:$0xff]   ;;  %v1307_v9 = vld [vmem:[#allocation5 + $0x34] ss:$8 sps:$4 sm:$0xff]   ;;  %v1309_v10 = vld [vmem:[#allocation5 + $0x30] ss:$8 sps:$4 sm:$0xff]  }
  0x2a   :  { %v1310_v11 = vld [vmem:[#allocation5 + $0x24] ss:$8 sps:$4 sm:$0xff]   ;;  %v1312_v12 = vld [vmem:[#allocation5 + $0x20] ss:$8 sps:$4 sm:$0xff]   ;;  %v1313_v13 = vld [vmem:[#allocation5 + $0x14] ss:$8 sps:$4 sm:$0xff]  }
  0x2b   :  { %v1315_v14 = vld [vmem:[#allocation5 + $0x10] ss:$8 sps:$4 sm:$0xff]   ;;  %v1316_v15 = vld [vmem:[#allocation5 + $0x4] ss:$8 sps:$4 sm:$0xff]   ;;  %v1318_v19 = vld [vmem:[#allocation5] ss:$8 sps:$4 sm:$0xff]  }
  0x2c   :  { %222 = vmatpush1.bf16.msra.mxu0 %v1300_v4  ;;  %v1319_v16 = vld [vmem:[#allocation7 + $0x78] sm:$0xff]   ;;  %v1321_v18 = vld [vmem:[#allocation7 + $0x70] sm:$0xff]   ;;  %v64_v21 = vld [vmem:[#allocation2 + $0x8] sm:$0xff] }
  0x2d   :  { %223 = vmatprep.subr.bf16.mxu0 %v1301_v5  ;;  %v1320_v17 = vld [vmem:[#allocation7 + $0x38] sm:$0xff]   ;;  %1174 = vmatprep.subr.bf16.mxu1 %v1319_v16  ;;  %v1322_v22 = vld [vmem:[#allocation7 + $0x30] sm:$0xff]   ;;  %v95_v23 = vpack.c.bf16 %v64_v21, %v63_v20  ;;  %v1323_v24 = vld [vmem:[#allocation7 + $0x68] sm:$0xff]  }
  0x2e   :  { %1175 = vmatpush3.bf16.msra.mxu1 %v1320_v17  ;;  %v1324_v25 = vld [vmem:[#allocation7 + $0x28] sm:$0xff]   ;;  %v1325_v26 = vld [vmem:[#allocation7 + $0x60] sm:$0xff]   ;;  %v65_v27 = vld [vmem:[#allocation2 + $0x10] sm:$0xff] }
  0x2f   :  { %1176 = vmatprep.subr.bf16.mxu1 %v1321_v18  ;;  %v66_v28 = vld [vmem:[#allocation2 + $0x18] sm:$0xff]  ;;  %v1326_v29 = vld [vmem:[#allocation7 + $0x20] sm:$0xff]   ;;  %v68_v34 = vld [vmem:[#allocation2 + $0x28] sm:$0xff]  ;;  %v129_v18 = vlaneseq }
  0x30   :  { %224 = vmatpush1.bf16.msra.mxu0 %v1303_v6  ;;  %v96_v30 = vpack.c.bf16 %v66_v28, %v65_v27  ;;  %v1327_v31 = vld [vmem:[#allocation7 + $0x58] sm:$0xff]   ;;  %v67_v33 = vld [vmem:[#allocation2 + $0x20] sm:$0xff]  ;;  %v69_v36 = vld [vmem:[#allocation2 + $0x30] sm:$0xff] }
  0x31   :  { %225 = vmatprep.subr.bf16.mxu0 %v1304_v7  ;;  %v1328_v32 = vld [vmem:[#allocation7 + $0x18] sm:$0xff]   ;;  %v97_v35 = vpack.c.bf16 %v68_v34, %v67_v33  ;;  %v71_v39 = vld [vmem:[#allocation2 + $0x40] sm:$0xff]  ;;  %v72_v40 = vld [vmem:[#allocation2 + $0x48] sm:$0xff] }
  0x32   :  { %1177 = vmatpush3.bf16.msra.mxu1 %v1322_v22  ;;  %v70_v37 = vld [vmem:[#allocation2 + $0x38] sm:$0xff]  ;;  %v99_v41 = vpack.c.bf16 %v72_v40, %v71_v39  ;;  %v73_v42 = vld [vmem:[#allocation2 + $0x50] sm:$0xff]  ;;  %v75_v45 = vld [vmem:[#allocation2 + $0x60] sm:$0xff] }
  0x33   :  { %1178 = vmatprep.subr.bf16.mxu1 %v1323_v24  ;;  %v98_v38 = vpack.c.bf16 %v70_v37, %v69_v36  ;;  %v74_v43 = vld [vmem:[#allocation2 + $0x58] sm:$0xff]  ;;  %v76_v46 = vld [vmem:[#allocation2 + $0x68] sm:$0xff]  ;;  %v77_v48 = vld [vmem:[#allocation2 + $0x70] sm:$0xff] }
  0x34   :  { %226 = vmatpush1.bf16.msra.mxu0 %v1306_v8  ;;  %v100_v44 = vpack.c.bf16 %v74_v43, %v73_v42  ;;  %v101_v47 = vpack.c.bf16 %v76_v46, %v75_v45  ;;  %v78_v49 = vld [vmem:[#allocation2 + $0x78] sm:$0xff]  ;;  %v79_v51 = vld [vmem:[#allocation2 + $0x80] sm:$0xff]  ;;  %v80_v52 = vld [vmem:[#allocation2 + $0x88] sm:$0xff] }
  0x35   :  { %227 = vmatprep.subr.bf16.mxu0 %v1307_v9  ;;  %v102_v50 = vpack.c.bf16 %v78_v49, %v77_v48  ;;  %v103_v53 = vpack.c.bf16 %v80_v52, %v79_v51  ;;  %v1329_v54 = vld [vmem:[#allocation7 + $0x50] sm:$0xff]   ;;  %v82_v56 = vld [vmem:[#allocation2 + $0x98] sm:$0xff]  ;;  %v1331_v59 = vld [vmem:[#allocation7 + $0x48] sm:$0xff]  }
  0x36   :  { %1179 = vmatpush3.bf16.msra.mxu1 %v1324_v25  ;;  %v81_v55 = vld [vmem:[#allocation2 + $0x90] sm:$0xff]  ;;  %v1332_v60 = vld [vmem:[#allocation7 + $0x8] sm:$0xff]   ;;  %v1333_v61 = vld [vmem:[#allocation7 + $0x40] sm:$0xff]  }
  0x37   :  { %1180 = vmatprep.subr.bf16.mxu1 %v1325_v26  ;;  %v1330_v57 = vld [vmem:[#allocation7 + $0x10] sm:$0xff]   ;;  %v104_v58 = vpack.c.bf16 %v82_v56, %v81_v55  ;;  %v83_v62 = vld [vmem:[#allocation2 + $0xa0] sm:$0xff]  ;;  %v84_v63 = vld [vmem:[#allocation2 + $0xa8] sm:$0xff] }
  0x38   :  { %228 = vmatpush1.bf16.msra.mxu0 %v1309_v10  ;;  %v1334_v1 = vld [vmem:[#allocation7] sm:$0xff]   ;;  %v105_v2 = vpack.c.bf16 %v84_v63, %v83_v62  ;;  %v85_v3 = vld [vmem:[#allocation2 + $0xb0] sm:$0xff]  ;;  %v86_v4 = vld [vmem:[#allocation2 + $0xb8] sm:$0xff] }
  0x39   :  { %229 = vmatprep.subr.bf16.mxu0 %v1310_v11  ;;  %v106_v5 = vpack.c.bf16 %v86_v4, %v85_v3  ;;  %v87_v6 = vld [vmem:[#allocation2 + $0xc0] sm:$0xff]  ;;  %v88_v7 = vld [vmem:[#allocation2 + $0xc8] sm:$0xff]  ;;  %v89_v9 = vld [vmem:[#allocation2 + $0xd0] sm:$0xff] }
  0x3a   :  { %1181 = vmatpush3.bf16.msra.mxu1 %v1326_v29  ;;  %v107_v8 = vpack.c.bf16 %v88_v7, %v87_v6  ;;  %v90_v10 = vld [vmem:[#allocation2 + $0xd8] sm:$0xff]  ;;  %v127_v22 = vld [vmem:[%s1604_s2] sm:$0x3] }
  0x3b   :  { %1182 = vmatprep.subr.bf16.mxu1 %v1327_v31  ;;  %v108_v11 = vpack.c.bf16 %v90_v10, %v89_v9  ;;  %v94_v16 = vld [vmem:[#allocation2 + $0xf8] sm:$0xff] }
  0x3c   :  { %230 = vmatpush1.bf16.msra.mxu0 %v1312_v12  ;;  %v91_v12 = vld [vmem:[#allocation2 + $0xe0] sm:$0xff] }
  0x3d   :  { %231 = vmatprep.subr.bf16.mxu0 %v1313_v13  ;;  %v92_v13 = vld [vmem:[#allocation2 + $0xe8] sm:$0xff] }
  0x3e   :  { %1183 = vmatpush3.bf16.msra.mxu1 %v1328_v32 }
  0x3f   :  { %1184 = vmatprep.subr.bf16.mxu1 %v1329_v54 }
  0x40   :  { %232 = vmatpush1.bf16.msra.mxu0 %v1315_v14  ;;  %v109_v14 = vpack.c.bf16 %v92_v13, %v91_v12 }
  0x41   :  { %233 = vmatprep.subr.bf16.mxu0 %v1316_v15  ;;  %v93_v15 = vld [vmem:[#allocation2 + $0xf0] sm:$0xff] }
  0x42   :  { %1185 = vmatpush3.bf16.msra.mxu1 %v1330_v57  ;;  %v110_v17 = vpack.c.bf16 %v94_v16, %v93_v15 }
  0x43   :  { %1186 = vmatprep.subr.bf16.mxu1 %v1331_v59 }
  0x44   :  { %234 = vmatpush1.bf16.msra.mxu0 %v1318_v19  ;;  %v130_v19 = vshrl.u32 %v129_v18, 7 }
  0x46   :  { %1187 = vmatpush3.bf16.msra.mxu1 %v1332_v60  ;;  %v135_v20 = vsub.s32 1, %v130_v19  ;;  %v131_v21 = vsub.s32 0, %v130_v19 }
  0x47   :  { %252 = vmatmul.mubr.bf16.vlgmr.msra.gmra.mxu0 %v95_v23  ;;  %1188 = vmatprep.subr.bf16.mxu1 %v1333_v61 }
  0x48   :  { %261 = vmatprep.mubr.bf16.mxu0 %v1428_v0  ;;  %v1491_v24 = vrot.slane %v127_v22, %v135_v20  ;;  %v1493_v25 = vrot.slane %v127_v22, %v131_v21 }
  0x4a   :  { %1189 = vmatpush3.bf16.msra.mxu1 %v1334_v1 }
  0x4f   :  { %262 = vmatmul.mubr.bf16.gmra.mxu0 %v96_v30 }
  0x50   :  { %271 = vmatprep.mubr.bf16.mxu0 %v1428_v0 }
  0x57   :  { %272 = vmatmul.mubr.bf16.gmra.mxu0 %v97_v35 }
  0x58   :  { %281 = vmatprep.mubr.bf16.mxu0 %v1428_v0 }
  0x5f   :  { %282 = vmatmul.mubr.bf16.gmra.mxu0 %v98_v38 }
  0x60   :  { %291 = vmatprep.mubr.bf16.mxu0 %v1428_v0 }
  0x67   :  { %292 = vmatmul.mubr.bf16.gmra.mxu0 %v99_v41 }
  0x68   :  { %301 = vmatprep.mubr.bf16.mxu0 %v1428_v0 }
  0x6f   :  { %302 = vmatmul.mubr.bf16.gmra.mxu0 %v100_v44 }
  0x70   :  { %311 = vmatprep.mubr.bf16.mxu0 %v1428_v0 }
  0x77   :  { %312 = vmatmul.mubr.bf16.gmra.mxu0 %v101_v47 }
  0x78   :  { %321 = vmatprep.mubr.bf16.mxu0 %v1428_v0 }
  0x7f   :  { %322 = vmatmul.mubr.bf16.gmra.mxu0 %v102_v50 }
  0x80   :  { %331 = vmatprep.mubr.bf16.mxu0 %v1428_v0 }
  0x87   :  { %332 = vmatmul.mubr.bf16.gmra.mxu0 %v103_v53 }
  0x88   :  { %341 = vmatprep.mubr.bf16.mxu0 %v1428_v0 }
  0x8f   :  { %342 = vmatmul.mubr.bf16.gmra.mxu0 %v104_v58 }
  0x90   :  { %351 = vmatprep.mubr.bf16.mxu0 %v1428_v0 }
  0x97   :  { %352 = vmatmul.mubr.bf16.gmra.mxu0 %v105_v2 }
  0x98   :  { %361 = vmatprep.mubr.bf16.mxu0 %v1428_v0 }
  0x9f   :  { %362 = vmatmul.mubr.bf16.gmra.mxu0 %v106_v5 }
  0xa0   :  { %371 = vmatprep.mubr.bf16.mxu0 %v1428_v0 }
  0xa7   :  { %372 = vmatmul.mubr.bf16.gmra.mxu0 %v107_v8 }
  0xa8   :  { %381 = vmatprep.mubr.bf16.mxu0 %v1428_v0 }
  0xaf   :  { %382 = vmatmul.mubr.bf16.gmra.mxu0 %v108_v11 }
  0xb0   :  { %391 = vmatprep.mubr.bf16.mxu0 %v1428_v0 }
  0xb7   :  { %392 = vmatmul.mubr.bf16.gmra.mxu0 %v109_v14 }
  0xb8   :  { %401 = vmatprep.mubr.bf16.mxu0 %v1428_v0 }
  0xbf   :  { %402 = vmatmul.mubr.bf16.gmra.mxu0 %v110_v17 }
 0x107   :  { %v253_v23 = vpop.f32.mrf.mxu0 }
 0x108   :  { %v254_v29 = vadd.f32 %v253_v23, %v1493_v25 }
 0x109   :  { %v255_v26 = vpop.f32.mrf.mxu0 }
 0x10a   :  { %v256_v0 = vadd.f32 %v255_v26, %v1491_v24  ;;  %v412_v36 = vmax.f32 %v254_v29, 0.0 }
 0x10b   :  { %v257_v27 = vpop.f32.mrf.mxu0 }
 0x10c   :  { %v258_v28 = vadd.f32 %v257_v27, %v1493_v25  ;;  %v413_v34 = vmax.f32 %v256_v0, 0.0 }
 0x10d   :  { %v259_v30 = vpop.f32.mrf.mxu0 }
 0x10e   :  { %v260_v31 = vadd.f32 %v259_v30, %v1491_v24  ;;  %v414_v32 = vmax.f32 %v258_v28, 0.0 }
 0x10f   :  { %v263_v33 = vpop.f32.mrf.mxu0 }
 0x110   :  { %v415_v35 = vmax.f32 %v260_v31, 0.0  ;;  %v476_v39 = vpack.c.bf16 %v414_v32, %v412_v36  ;;  %v264_v43 = vadd.f32 %v263_v33, %v1493_v25 }
 0x111   :  { %v265_v37 = vpop.f32.mrf.mxu0 }
 0x112   :  { %v477_v38 = vpack.c.bf16 %v415_v35, %v413_v34  ;;  %v266_v41 = vadd.f32 %v265_v37, %v1491_v24  ;;  %v416_v50 = vmax.f32 %v264_v43, 0.0 }
 0x113   :  { %v267_v40 = vpop.f32.mrf.mxu0 }
 0x114   :  { %v268_v42 = vadd.f32 %v267_v40, %v1493_v25  ;;  %675 = vmatprep.mubr.bf16.mxu1 %v477_v38  ;;  %v417_v48 = vmax.f32 %v266_v41, 0.0 }
 0x115   :  { %v269_v44 = vpop.f32.mrf.mxu0  ;;  %676 = vmatmul.mubr.bf16.vlgmr.msra.gmra.mxu1 %v476_v39 }
 0x116   :  { %v270_v45 = vadd.f32 %v269_v44, %v1491_v24  ;;  %v418_v46 = vmax.f32 %v268_v42, 0.0 }
 0x117   :  { %v273_v47 = vpop.f32.mrf.mxu0 }
 0x118   :  { %v419_v49 = vmax.f32 %v270_v45, 0.0  ;;  %v478_v53 = vpack.c.bf16 %v418_v46, %v416_v50  ;;  %v274_v57 = vadd.f32 %v273_v47, %v1493_v25 }
 0x119   :  { %v275_v51 = vpop.f32.mrf.mxu0 }
 0x11a   :  { %v479_v52 = vpack.c.bf16 %v419_v49, %v417_v48  ;;  %v276_v55 = vadd.f32 %v275_v51, %v1491_v24  ;;  %v420_v1 = vmax.f32 %v274_v57, 0.0 }
 0x11b   :  { %v277_v54 = vpop.f32.mrf.mxu0 }
 0x11c   :  { %v278_v56 = vadd.f32 %v277_v54, %v1493_v25  ;;  %683 = vmatprep.mubr.bf16.mxu1 %v479_v52  ;;  %v421_v62 = vmax.f32 %v276_v55, 0.0 }
 0x11d   :  { %v279_v58 = vpop.f32.mrf.mxu0  ;;  %684 = vmatmul.mubr.bf16.gmra.mxu1 %v478_v53 }
 0x11e   :  { %v280_v59 = vadd.f32 %v279_v58, %v1491_v24  ;;  %v422_v60 = vmax.f32 %v278_v56, 0.0 }
 0x11f   :  { %v283_v61 = vpop.f32.mrf.mxu0 }
 0x120   :  { %v423_v63 = vmax.f32 %v280_v59, 0.0  ;;  %v480_v4 = vpack.c.bf16 %v422_v60, %v420_v1  ;;  %v284_v8 = vadd.f32 %v283_v61, %v1493_v25 }
 0x121   :  { %v285_v2 = vpop.f32.mrf.mxu0 }
 0x122   :  { %v481_v3 = vpack.c.bf16 %v423_v63, %v421_v62  ;;  %v286_v6 = vadd.f32 %v285_v2, %v1491_v24  ;;  %v424_v15 = vmax.f32 %v284_v8, 0.0 }
 0x123   :  { %v287_v5 = vpop.f32.mrf.mxu0 }
 0x124   :  { %v288_v7 = vadd.f32 %v287_v5, %v1493_v25  ;;  %691 = vmatprep.mubr.bf16.mxu1 %v481_v3  ;;  %v425_v13 = vmax.f32 %v286_v6, 0.0 }
 0x125   :  { %v289_v9 = vpop.f32.mrf.mxu0  ;;  %692 = vmatmul.mubr.bf16.gmra.mxu1 %v480_v4 }
 0x126   :  { %v290_v10 = vadd.f32 %v289_v9, %v1491_v24  ;;  %v426_v11 = vmax.f32 %v288_v7, 0.0 }
 0x127   :  { %v293_v12 = vpop.f32.mrf.mxu0 }
 0x128   :  { %v427_v14 = vmax.f32 %v290_v10, 0.0  ;;  %v482_v18 = vpack.c.bf16 %v426_v11, %v424_v15  ;;  %v294_v22 = vadd.f32 %v293_v12, %v1493_v25 }
 0x129   :  { %v295_v16 = vpop.f32.mrf.mxu0 }
 0x12a   :  { %v483_v17 = vpack.c.bf16 %v427_v14, %v425_v13  ;;  %v296_v20 = vadd.f32 %v295_v16, %v1491_v24  ;;  %v428_v30 = vmax.f32 %v294_v22, 0.0 }
 0x12b   :  { %v297_v19 = vpop.f32.mrf.mxu0 }
 0x12c   :  { %v298_v21 = vadd.f32 %v297_v19, %v1493_v25  ;;  %699 = vmatprep.mubr.bf16.mxu1 %v483_v17  ;;  %v429_v28 = vmax.f32 %v296_v20, 0.0 }
 0x12d   :  { %v299_v23 = vpop.f32.mrf.mxu0  ;;  %700 = vmatmul.mubr.bf16.gmra.mxu1 %v482_v18 }
 0x12e   :  { %v300_v26 = vadd.f32 %v299_v23, %v1491_v24  ;;  %v430_v27 = vmax.f32 %v298_v21, 0.0 }
 0x12f   :  { %v303_v0 = vpop.f32.mrf.mxu0 }
 0x130   :  { %v431_v29 = vmax.f32 %v300_v26, 0.0  ;;  %v484_v33 = vpack.c.bf16 %v430_v27, %v428_v30  ;;  %v304_v37 = vadd.f32 %v303_v0, %v1493_v25 }
 0x131   :  { %v305_v31 = vpop.f32.mrf.mxu0 }
 0x132   :  { %v485_v32 = vpack.c.bf16 %v431_v29, %v429_v28  ;;  %v306_v35 = vadd.f32 %v305_v31, %v1491_v24  ;;  %v432_v44 = vmax.f32 %v304_v37, 0.0 }
 0x133   :  { %v307_v34 = vpop.f32.mrf.mxu0 }
 0x134   :  { %v308_v36 = vadd.f32 %v307_v34, %v1493_v25  ;;  %707 = vmatprep.mubr.bf16.mxu1 %v485_v32  ;;  %v433_v42 = vmax.f32 %v306_v35, 0.0 }
 0x135   :  { %v309_v38 = vpop.f32.mrf.mxu0  ;;  %708 = vmatmul.mubr.bf16.gmra.mxu1 %v484_v33 }
 0x136   :  { %v310_v39 = vadd.f32 %v309_v38, %v1491_v24  ;;  %v434_v40 = vmax.f32 %v308_v36, 0.0 }
 0x137   :  { %v313_v41 = vpop.f32.mrf.mxu0 }
 0x138   :  { %v435_v43 = vmax.f32 %v310_v39, 0.0  ;;  %v486_v47 = vpack.c.bf16 %v434_v40, %v432_v44  ;;  %v314_v51 = vadd.f32 %v313_v41, %v1493_v25 }
 0x139   :  { %v315_v45 = vpop.f32.mrf.mxu0 }
 0x13a   :  { %v487_v46 = vpack.c.bf16 %v435_v43, %v433_v42  ;;  %v316_v49 = vadd.f32 %v315_v45, %v1491_v24  ;;  %v436_v58 = vmax.f32 %v314_v51, 0.0 }
 0x13b   :  { %v317_v48 = vpop.f32.mrf.mxu0 }
 0x13c   :  { %v318_v50 = vadd.f32 %v317_v48, %v1493_v25  ;;  %715 = vmatprep.mubr.bf16.mxu1 %v487_v46  ;;  %v437_v56 = vmax.f32 %v316_v49, 0.0 }
 0x13d   :  { %v319_v52 = vpop.f32.mrf.mxu0  ;;  %716 = vmatmul.mubr.bf16.gmra.mxu1 %v486_v47 }
 0x13e   :  { %v320_v53 = vadd.f32 %v319_v52, %v1491_v24  ;;  %v438_v54 = vmax.f32 %v318_v50, 0.0 }
 0x13f   :  { %v323_v55 = vpop.f32.mrf.mxu0 }
 0x140   :  { %v439_v57 = vmax.f32 %v320_v53, 0.0  ;;  %v488_v61 = vpack.c.bf16 %v438_v54, %v436_v58  ;;  %v324_v2 = vadd.f32 %v323_v55, %v1493_v25 }
 0x141   :  { %v325_v59 = vpop.f32.mrf.mxu0 }
 0x142   :  { %v489_v60 = vpack.c.bf16 %v439_v57, %v437_v56  ;;  %v326_v63 = vadd.f32 %v325_v59, %v1491_v24  ;;  %v440_v9 = vmax.f32 %v324_v2, 0.0 }
 0x143   :  { %v327_v62 = vpop.f32.mrf.mxu0 }
 0x144   :  { %v328_v1 = vadd.f32 %v327_v62, %v1493_v25  ;;  %723 = vmatprep.mubr.bf16.mxu1 %v489_v60  ;;  %v441_v7 = vmax.f32 %v326_v63, 0.0 }
 0x145   :  { %v329_v3 = vpop.f32.mrf.mxu0  ;;  %724 = vmatmul.mubr.bf16.gmra.mxu1 %v488_v61 }
 0x146   :  { %v330_v4 = vadd.f32 %v329_v3, %v1491_v24  ;;  %v442_v5 = vmax.f32 %v328_v1, 0.0 }
 0x147   :  { %v333_v6 = vpop.f32.mrf.mxu0 }
 0x148   :  { %v443_v8 = vmax.f32 %v330_v4, 0.0  ;;  %v490_v12 = vpack.c.bf16 %v442_v5, %v440_v9  ;;  %v334_v16 = vadd.f32 %v333_v6, %v1493_v25 }
 0x149   :  { %v335_v10 = vpop.f32.mrf.mxu0 }
 0x14a   :  { %v491_v11 = vpack.c.bf16 %v443_v8, %v441_v7  ;;  %v336_v14 = vadd.f32 %v335_v10, %v1491_v24  ;;  %v444_v23 = vmax.f32 %v334_v16, 0.0 }
 0x14b   :  { %v337_v13 = vpop.f32.mrf.mxu0 }
 0x14c   :  { %v338_v15 = vadd.f32 %v337_v13, %v1493_v25  ;;  %731 = vmatprep.mubr.bf16.mxu1 %v491_v11  ;;  %v445_v21 = vmax.f32 %v336_v14, 0.0 }
 0x14d   :  { %v339_v17 = vpop.f32.mrf.mxu0  ;;  %732 = vmatmul.mubr.bf16.gmra.mxu1 %v490_v12 }
 0x14e   :  { %v340_v18 = vadd.f32 %v339_v17, %v1491_v24  ;;  %v446_v19 = vmax.f32 %v338_v15, 0.0 }
 0x14f   :  { %v343_v20 = vpop.f32.mrf.mxu0 }
 0x150   :  { %v447_v22 = vmax.f32 %v340_v18, 0.0  ;;  %v492_v0 = vpack.c.bf16 %v446_v19, %v444_v23  ;;  %v344_v31 = vadd.f32 %v343_v20, %v1493_v25 }
 0x151   :  { %v345_v26 = vpop.f32.mrf.mxu0 }
 0x152   :  { %v493_v27 = vpack.c.bf16 %v447_v22, %v445_v21  ;;  %v346_v29 = vadd.f32 %v345_v26, %v1491_v24  ;;  %v448_v38 = vmax.f32 %v344_v31, 0.0 }
 0x153   :  { %v347_v28 = vpop.f32.mrf.mxu0 }
 0x154   :  { %v348_v30 = vadd.f32 %v347_v28, %v1493_v25  ;;  %739 = vmatprep.mubr.bf16.mxu1 %v493_v27  ;;  %v449_v36 = vmax.f32 %v346_v29, 0.0 }
 0x155   :  { %v349_v32 = vpop.f32.mrf.mxu0  ;;  %740 = vmatmul.mubr.bf16.gmra.mxu1 %v492_v0 }
 0x156   :  { %v350_v33 = vadd.f32 %v349_v32, %v1491_v24  ;;  %v450_v34 = vmax.f32 %v348_v30, 0.0 }
 0x157   :  { %v353_v35 = vpop.f32.mrf.mxu0 }
 0x158   :  { %v451_v37 = vmax.f32 %v350_v33, 0.0  ;;  %v494_v41 = vpack.c.bf16 %v450_v34, %v448_v38  ;;  %v354_v45 = vadd.f32 %v353_v35, %v1493_v25 }
 0x159   :  { %v355_v39 = vpop.f32.mrf.mxu0 }
 0x15a   :  { %v495_v40 = vpack.c.bf16 %v451_v37, %v449_v36  ;;  %v356_v43 = vadd.f32 %v355_v39, %v1491_v24  ;;  %v452_v52 = vmax.f32 %v354_v45, 0.0 }
 0x15b   :  { %v357_v42 = vpop.f32.mrf.mxu0 }
 0x15c   :  { %v358_v44 = vadd.f32 %v357_v42, %v1493_v25  ;;  %747 = vmatprep.mubr.bf16.mxu1 %v495_v40  ;;  %v453_v50 = vmax.f32 %v356_v43, 0.0 }
 0x15d   :  { %v359_v46 = vpop.f32.mrf.mxu0  ;;  %748 = vmatmul.mubr.bf16.gmra.mxu1 %v494_v41 }
 0x15e   :  { %v360_v47 = vadd.f32 %v359_v46, %v1491_v24  ;;  %v454_v48 = vmax.f32 %v358_v44, 0.0 }
 0x15f   :  { %v363_v49 = vpop.f32.mrf.mxu0 }
 0x160   :  { %v455_v51 = vmax.f32 %v360_v47, 0.0  ;;  %v496_v55 = vpack.c.bf16 %v454_v48, %v452_v52  ;;  %v364_v59 = vadd.f32 %v363_v49, %v1493_v25 }
 0x161   :  { %v365_v53 = vpop.f32.mrf.mxu0 }
 0x162   :  { %v497_v54 = vpack.c.bf16 %v455_v51, %v453_v50  ;;  %v366_v57 = vadd.f32 %v365_v53, %v1491_v24  ;;  %v456_v3 = vmax.f32 %v364_v59, 0.0 }
 0x163   :  { %v367_v56 = vpop.f32.mrf.mxu0 }
 0x164   :  { %v368_v58 = vadd.f32 %v367_v56, %v1493_v25  ;;  %755 = vmatprep.mubr.bf16.mxu1 %v497_v54  ;;  %v457_v1 = vmax.f32 %v366_v57, 0.0 }
 0x165   :  { %v369_v60 = vpop.f32.mrf.mxu0  ;;  %756 = vmatmul.mubr.bf16.gmra.mxu1 %v496_v55 }
 0x166   :  { %v370_v61 = vadd.f32 %v369_v60, %v1491_v24  ;;  %v458_v62 = vmax.f32 %v368_v58, 0.0 }
 0x167   :  { %v373_v63 = vpop.f32.mrf.mxu0 }
 0x168   :  { %v459_v2 = vmax.f32 %v370_v61, 0.0  ;;  %v498_v6 = vpack.c.bf16 %v458_v62, %v456_v3  ;;  %v374_v10 = vadd.f32 %v373_v63, %v1493_v25 }
 0x169   :  { %v375_v4 = vpop.f32.mrf.mxu0 }
 0x16a   :  { %v499_v5 = vpack.c.bf16 %v459_v2, %v457_v1  ;;  %v376_v8 = vadd.f32 %v375_v4, %v1491_v24  ;;  %v460_v17 = vmax.f32 %v374_v10, 0.0 }
 0x16b   :  { %v377_v7 = vpop.f32.mrf.mxu0 }
 0x16c   :  { %v378_v9 = vadd.f32 %v377_v7, %v1493_v25  ;;  %763 = vmatprep.mubr.bf16.mxu1 %v499_v5  ;;  %v461_v15 = vmax.f32 %v376_v8, 0.0 }
 0x16d   :  { %v379_v11 = vpop.f32.mrf.mxu0  ;;  %764 = vmatmul.mubr.bf16.gmra.mxu1 %v498_v6 }
 0x16e   :  { %v380_v12 = vadd.f32 %v379_v11, %v1491_v24  ;;  %v462_v13 = vmax.f32 %v378_v9, 0.0 }
 0x16f   :  { %v383_v14 = vpop.f32.mrf.mxu0 }
 0x170   :  { %v463_v16 = vmax.f32 %v380_v12, 0.0  ;;  %v500_v20 = vpack.c.bf16 %v462_v13, %v460_v17  ;;  %v384_v26 = vadd.f32 %v383_v14, %v1493_v25 }
 0x171   :  { %v385_v18 = vpop.f32.mrf.mxu0 }
 0x172   :  { %v501_v19 = vpack.c.bf16 %v463_v16, %v461_v15  ;;  %v386_v22 = vadd.f32 %v385_v18, %v1491_v24  ;;  %v464_v32 = vmax.f32 %v384_v26, 0.0 }
 0x173   :  { %v387_v21 = vpop.f32.mrf.mxu0 }
 0x174   :  { %v388_v23 = vadd.f32 %v387_v21, %v1493_v25  ;;  %771 = vmatprep.mubr.bf16.mxu1 %v501_v19  ;;  %v465_v30 = vmax.f32 %v386_v22, 0.0 }
 0x175   :  { %v389_v27 = vpop.f32.mrf.mxu0  ;;  %772 = vmatmul.mubr.bf16.gmra.mxu1 %v500_v20 }
 0x176   :  { %v390_v0 = vadd.f32 %v389_v27, %v1491_v24  ;;  %v466_v28 = vmax.f32 %v388_v23, 0.0 }
 0x177   :  { %v393_v29 = vpop.f32.mrf.mxu0 }
 0x178   :  { %v467_v31 = vmax.f32 %v390_v0, 0.0  ;;  %v502_v35 = vpack.c.bf16 %v466_v28, %v464_v32  ;;  %v394_v39 = vadd.f32 %v393_v29, %v1493_v25 }
 0x179   :  { %v395_v33 = vpop.f32.mrf.mxu0 }
 0x17a   :  { %v503_v34 = vpack.c.bf16 %v467_v31, %v465_v30  ;;  %v396_v37 = vadd.f32 %v395_v33, %v1491_v24  ;;  %v468_v46 = vmax.f32 %v394_v39, 0.0 }
 0x17b   :  { %v397_v36 = vpop.f32.mrf.mxu0 }
 0x17c   :  { %v398_v38 = vadd.f32 %v397_v36, %v1493_v25  ;;  %779 = vmatprep.mubr.bf16.mxu1 %v503_v34  ;;  %v469_v44 = vmax.f32 %v396_v37, 0.0 }
 0x17d   :  { %v399_v40 = vpop.f32.mrf.mxu0  ;;  %780 = vmatmul.mubr.bf16.gmra.mxu1 %v502_v35 }
 0x17e   :  { %v400_v41 = vadd.f32 %v399_v40, %v1491_v24  ;;  %v470_v42 = vmax.f32 %v398_v38, 0.0 }
 0x17f   :  { %v403_v43 = vpop.f32.mrf.mxu0 }
 0x180   :  { %v471_v45 = vmax.f32 %v400_v41, 0.0  ;;  %v504_v49 = vpack.c.bf16 %v470_v42, %v468_v46  ;;  %v404_v53 = vadd.f32 %v403_v43, %v1493_v25 }
 0x181   :  { %v405_v47 = vpop.f32.mrf.mxu0 }
 0x182   :  { %v505_v48 = vpack.c.bf16 %v471_v45, %v469_v44  ;;  %v406_v51 = vadd.f32 %v405_v47, %v1491_v24  ;;  %v472_v59 = vmax.f32 %v404_v53, 0.0 }
 0x183   :  { %v407_v50 = vpop.f32.mrf.mxu0 }
 0x184   :  { %v408_v52 = vadd.f32 %v407_v50, %v1493_v25  ;;  %787 = vmatprep.mubr.bf16.mxu1 %v505_v48  ;;  %v473_v57 = vmax.f32 %v406_v51, 0.0  ;;  %v1562_v25 = vld [vmem:[%s1606_s4] ss:$0 sm:$0xff]  ;;  %s1429_s4 = smov [#allocation8]  }
 0x185   :  { %v409_v54 = vpop.f32.mrf.mxu0  ;;  %788 = vmatmul.mubr.bf16.gmra.mxu1 %v504_v49  ;;  %s969_s12 = sshll.u32 %s1429_s4, 4  ;;  %s970_s12 = int_to_ptr.vmem [resolvable:$true] %s969_s12 }
 0x186   :  { %v410_v55 = vadd.f32 %v409_v54, %v1491_v24  ;;  %v474_v56 = vmax.f32 %v408_v52, 0.0  ;;  %s1395_s13 = scalar_lea.vmem %s970_s12, 2048  ;;  %p1400_p2 = scmp.lt.s32.totalorder %s970_s12, %s970_s12 }
 0x187   :  { %p1396_p1 = scmp.ne.s32.totalorder %s970_s12, %s1395_s13  ;;  %p1401_p3 = scmp.lt.s32.totalorder %s1395_s13, %s1395_s13 }
 0x188   :  { %v475_v58 = vmax.f32 %v410_v55, 0.0  ;;  %v506_v61 = vpack.c.bf16 %v474_v56, %v472_v59 }
 0x189   :  { %p1402_p4 = por %p1401_p3, %p1400_p2 }
 0x18a   :  { %v507_v60 = vpack.c.bf16 %v475_v58, %v473_v57 }
 0x18b   :  { %p1403_p5 = pnand %p1402_p4, %p1396_p1 }
 0x18c   :  { %795 = vmatprep.mubr.bf16.mxu1 %v507_v60 }
 0x18d   :  { %796 = vmatmul.mubr.bf16.gmra.mxu1 %v506_v61 }
 0x1d5   :  { %v1190_v62 = vpop.f32.mrf.mxu1 }
 0x1d7   :  { %v1191_v63 = vpop.f32.mrf.mxu1 }
 0x1d8   :  { %v1192_v2 = vadd.f32 %v1191_v63, %v1190_v62 }
 0x1d9   :  { %v1193_v1 = vpop.f32.mrf.mxu1 }
 0x1da   :  { %v678_v5 = vadd.f32 %v1192_v2, %v1562_v25 }
 0x1db   :  { %v1194_v3 = vpop.f32.mrf.mxu1 }
 0x1dc   :  { %v1195_v4 = vadd.f32 %v1194_v3, %v1193_v1 }
 0x1dd   :  { %v1196_v24 = vpop.f32.mrf.mxu1 }
 0x1de   :  { %v681_v6 = vadd.f32 %v1195_v4, %v1562_v25 }
 0x1df   :  { %v1197_v7 = vpop.f32.mrf.mxu1 }
 0x1e0   :  { %v1082_v8 = vpack.c.bf16 %v681_v6, %v678_v5  ;;  %v1198_v10 = vadd.f32 %v1197_v7, %v1196_v24 }
 0x1e1   :  { %v1199_v9 = vpop.f32.mrf.mxu1 }
 0x1e2   :  { %1083 = vst [vmem:[#allocation8] sm:$0xff] %v1082_v8   ;;  %v686_v14 = vadd.f32 %v1198_v10, %v1562_v25 }
 0x1e3   :  { %v1200_v11 = vpop.f32.mrf.mxu1 }
 0x1e4   :  { %v1201_v12 = vadd.f32 %v1200_v11, %v1199_v9 }
 0x1e5   :  { %v1202_v13 = vpop.f32.mrf.mxu1 }
 0x1e6   :  { %v689_v15 = vadd.f32 %v1201_v12, %v1562_v25 }
 0x1e7   :  { %v1203_v16 = vpop.f32.mrf.mxu1 }
 0x1e8   :  { %v1087_v17 = vpack.c.bf16 %v689_v15, %v686_v14  ;;  %v1204_v19 = vadd.f32 %v1203_v16, %v1202_v13 }
 0x1e9   :  { %v1205_v18 = vpop.f32.mrf.mxu1 }
 0x1ea   :  { %1159 = vst [vmem:[#allocation8 + $0x8] sm:$0xff] %v1087_v17   ;;  %v694_v23 = vadd.f32 %v1204_v19, %v1562_v25 }
 0x1eb   :  { %v1206_v20 = vpop.f32.mrf.mxu1 }
 0x1ec   :  { %v1207_v21 = vadd.f32 %v1206_v20, %v1205_v18 }
 0x1ed   :  { %v1208_v22 = vpop.f32.mrf.mxu1 }
 0x1ee   :  { %v697_v26 = vadd.f32 %v1207_v21, %v1562_v25 }
 0x1ef   :  { %v1209_v27 = vpop.f32.mrf.mxu1 }
 0x1f0   :  { %v1092_v0 = vpack.c.bf16 %v697_v26, %v694_v23  ;;  %v1210_v29 = vadd.f32 %v1209_v27, %v1208_v22 }
 0x1f1   :  { %v1211_v28 = vpop.f32.mrf.mxu1 }
 0x1f2   :  { %1160 = vst [vmem:[#allocation8 + $0x10] sm:$0xff] %v1092_v0   ;;  %v702_v33 = vadd.f32 %v1210_v29, %v1562_v25 }
 0x1f3   :  { %v1212_v30 = vpop.f32.mrf.mxu1 }
 0x1f4   :  { %v1213_v31 = vadd.f32 %v1212_v30, %v1211_v28 }
 0x1f5   :  { %v1214_v32 = vpop.f32.mrf.mxu1 }
 0x1f6   :  { %v705_v34 = vadd.f32 %v1213_v31, %v1562_v25 }
 0x1f7   :  { %v1215_v35 = vpop.f32.mrf.mxu1 }
 0x1f8   :  { %v1097_v36 = vpack.c.bf16 %v705_v34, %v702_v33  ;;  %v1216_v38 = vadd.f32 %v1215_v35, %v1214_v32 }
 0x1f9   :  { %v1217_v37 = vpop.f32.mrf.mxu1 }
 0x1fa   :  { %1161 = vst [vmem:[#allocation8 + $0x18] sm:$0xff] %v1097_v36   ;;  %v710_v42 = vadd.f32 %v1216_v38, %v1562_v25 }
 0x1fb   :  { %v1218_v39 = vpop.f32.mrf.mxu1 }
 0x1fc   :  { %v1219_v40 = vadd.f32 %v1218_v39, %v1217_v37 }
 0x1fd   :  { %v1220_v41 = vpop.f32.mrf.mxu1 }
 0x1fe   :  { %v713_v43 = vadd.f32 %v1219_v40, %v1562_v25 }
 0x1ff   :  { %v1221_v44 = vpop.f32.mrf.mxu1 }
 0x200   :  { %v1102_v45 = vpack.c.bf16 %v713_v43, %v710_v42  ;;  %v1222_v47 = vadd.f32 %v1221_v44, %v1220_v41 }
 0x201   :  { %v1223_v46 = vpop.f32.mrf.mxu1 }
 0x202   :  { %1162 = vst [vmem:[#allocation8 + $0x20] sm:$0xff] %v1102_v45   ;;  %v718_v51 = vadd.f32 %v1222_v47, %v1562_v25 }
 0x203   :  { %v1224_v48 = vpop.f32.mrf.mxu1 }
 0x204   :  { %v1225_v49 = vadd.f32 %v1224_v48, %v1223_v46 }
 0x205   :  { %v1226_v50 = vpop.f32.mrf.mxu1 }
 0x206   :  { %v721_v52 = vadd.f32 %v1225_v49, %v1562_v25 }
 0x207   :  { %v1227_v53 = vpop.f32.mrf.mxu1 }
 0x208   :  { %v1107_v54 = vpack.c.bf16 %v721_v52, %v718_v51  ;;  %v1228_v56 = vadd.f32 %v1227_v53, %v1226_v50 }
 0x209   :  { %v1229_v55 = vpop.f32.mrf.mxu1 }
 0x20a   :  { %1163 = vst [vmem:[#allocation8 + $0x28] sm:$0xff] %v1107_v54   ;;  %v726_v60 = vadd.f32 %v1228_v56, %v1562_v25 }
 0x20b   :  { %v1230_v57 = vpop.f32.mrf.mxu1 }
 0x20c   :  { %v1231_v58 = vadd.f32 %v1230_v57, %v1229_v55 }
 0x20d   :  { %v1232_v59 = vpop.f32.mrf.mxu1 }
 0x20e   :  { %v729_v61 = vadd.f32 %v1231_v58, %v1562_v25 }
 0x20f   :  { %v1233_v62 = vpop.f32.mrf.mxu1 }
 0x210   :  { %v1112_v63 = vpack.c.bf16 %v729_v61, %v726_v60  ;;  %v1234_v2 = vadd.f32 %v1233_v62, %v1232_v59 }
 0x211   :  { %v1235_v1 = vpop.f32.mrf.mxu1 }
 0x212   :  { %1164 = vst [vmem:[#allocation8 + $0x30] sm:$0xff] %v1112_v63   ;;  %v734_v5 = vadd.f32 %v1234_v2, %v1562_v25 }
 0x213   :  { %v1236_v3 = vpop.f32.mrf.mxu1 }
 0x214   :  { %v1237_v4 = vadd.f32 %v1236_v3, %v1235_v1 }
 0x215   :  { %v1238_v24 = vpop.f32.mrf.mxu1 }
 0x216   :  { %v737_v6 = vadd.f32 %v1237_v4, %v1562_v25 }
 0x217   :  { %v1239_v7 = vpop.f32.mrf.mxu1 }
 0x218   :  { %v1117_v8 = vpack.c.bf16 %v737_v6, %v734_v5  ;;  %v1240_v10 = vadd.f32 %v1239_v7, %v1238_v24 }
 0x219   :  { %v1241_v9 = vpop.f32.mrf.mxu1 }
 0x21a   :  { %1165 = vst [vmem:[#allocation8 + $0x38] sm:$0xff] %v1117_v8   ;;  %v742_v14 = vadd.f32 %v1240_v10, %v1562_v25 }
 0x21b   :  { %v1242_v11 = vpop.f32.mrf.mxu1 }
 0x21c   :  { %v1243_v12 = vadd.f32 %v1242_v11, %v1241_v9 }
 0x21d   :  { %v1244_v13 = vpop.f32.mrf.mxu1 }
 0x21e   :  { %v745_v15 = vadd.f32 %v1243_v12, %v1562_v25 }
 0x21f   :  { %v1245_v16 = vpop.f32.mrf.mxu1 }
 0x220   :  { %v1122_v17 = vpack.c.bf16 %v745_v15, %v742_v14  ;;  %v1246_v19 = vadd.f32 %v1245_v16, %v1244_v13 }
 0x221   :  { %v1247_v18 = vpop.f32.mrf.mxu1 }
 0x222   :  { %1166 = vst [vmem:[#allocation8 + $0x40] sm:$0xff] %v1122_v17   ;;  %v750_v23 = vadd.f32 %v1246_v19, %v1562_v25 }
 0x223   :  { %v1248_v20 = vpop.f32.mrf.mxu1 }
 0x224   :  { %v1249_v21 = vadd.f32 %v1248_v20, %v1247_v18 }
 0x225   :  { %v1250_v22 = vpop.f32.mrf.mxu1 }
 0x226   :  { %v753_v26 = vadd.f32 %v1249_v21, %v1562_v25 }
 0x227   :  { %v1251_v27 = vpop.f32.mrf.mxu1 }
 0x228   :  { %v1127_v0 = vpack.c.bf16 %v753_v26, %v750_v23  ;;  %v1252_v29 = vadd.f32 %v1251_v27, %v1250_v22 }
 0x229   :  { %v1253_v28 = vpop.f32.mrf.mxu1 }
 0x22a   :  { %1167 = vst [vmem:[#allocation8 + $0x48] sm:$0xff] %v1127_v0   ;;  %v758_v33 = vadd.f32 %v1252_v29, %v1562_v25 }
 0x22b   :  { %v1254_v30 = vpop.f32.mrf.mxu1 }
 0x22c   :  { %v1255_v31 = vadd.f32 %v1254_v30, %v1253_v28 }
 0x22d   :  { %v1256_v32 = vpop.f32.mrf.mxu1 }
 0x22e   :  { %v761_v34 = vadd.f32 %v1255_v31, %v1562_v25 }
 0x22f   :  { %v1257_v35 = vpop.f32.mrf.mxu1 }
 0x230   :  { %v1132_v36 = vpack.c.bf16 %v761_v34, %v758_v33  ;;  %v1258_v38 = vadd.f32 %v1257_v35, %v1256_v32 }
 0x231   :  { %v1259_v37 = vpop.f32.mrf.mxu1 }
 0x232   :  { %1168 = vst [vmem:[#allocation8 + $0x50] sm:$0xff] %v1132_v36   ;;  %v766_v42 = vadd.f32 %v1258_v38, %v1562_v25 }
 0x233   :  { %v1260_v39 = vpop.f32.mrf.mxu1 }
 0x234   :  { %v1261_v40 = vadd.f32 %v1260_v39, %v1259_v37 }
 0x235   :  { %v1262_v41 = vpop.f32.mrf.mxu1 }
 0x236   :  { %v769_v43 = vadd.f32 %v1261_v40, %v1562_v25 }
 0x237   :  { %v1263_v44 = vpop.f32.mrf.mxu1 }
 0x238   :  { %v1137_v45 = vpack.c.bf16 %v769_v43, %v766_v42  ;;  %v1264_v47 = vadd.f32 %v1263_v44, %v1262_v41 }
 0x239   :  { %v1265_v46 = vpop.f32.mrf.mxu1 }
 0x23a   :  { %1169 = vst [vmem:[#allocation8 + $0x58] sm:$0xff] %v1137_v45   ;;  %v774_v51 = vadd.f32 %v1264_v47, %v1562_v25 }
 0x23b   :  { %v1266_v48 = vpop.f32.mrf.mxu1 }
 0x23c   :  { %v1267_v49 = vadd.f32 %v1266_v48, %v1265_v46 }
 0x23d   :  { %v1268_v50 = vpop.f32.mrf.mxu1 }
 0x23e   :  { %v777_v52 = vadd.f32 %v1267_v49, %v1562_v25 }
 0x23f   :  { %v1269_v53 = vpop.f32.mrf.mxu1 }
 0x240   :  { %v1142_v54 = vpack.c.bf16 %v777_v52, %v774_v51  ;;  %v1270_v56 = vadd.f32 %v1269_v53, %v1268_v50 }
 0x241   :  { %v1271_v55 = vpop.f32.mrf.mxu1 }
 0x242   :  { %1170 = vst [vmem:[#allocation8 + $0x60] sm:$0xff] %v1142_v54   ;;  %v782_v60 = vadd.f32 %v1270_v56, %v1562_v25 }
 0x243   :  { %v1272_v57 = vpop.f32.mrf.mxu1 }
 0x244   :  { %v1273_v58 = vadd.f32 %v1272_v57, %v1271_v55 }
 0x245   :  { %v1274_v59 = vpop.f32.mrf.mxu1 }
 0x246   :  { %v785_v61 = vadd.f32 %v1273_v58, %v1562_v25 }
 0x247   :  { %v1275_v62 = vpop.f32.mrf.mxu1 }
 0x248   :  { %v1147_v63 = vpack.c.bf16 %v785_v61, %v782_v60  ;;  %v1276_v2 = vadd.f32 %v1275_v62, %v1274_v59 }
 0x249   :  { %v1277_v1 = vpop.f32.mrf.mxu1 }
 0x24a   :  { %1171 = vst [vmem:[#allocation8 + $0x68] sm:$0xff] %v1147_v63   ;;  %v790_v5 = vadd.f32 %v1276_v2, %v1562_v25 }
 0x24b   :  { %v1278_v3 = vpop.f32.mrf.mxu1 }
 0x24c   :  { %v1279_v4 = vadd.f32 %v1278_v3, %v1277_v1 }
 0x24d   :  { %v1280_v24 = vpop.f32.mrf.mxu1 }
 0x24e   :  { %v793_v6 = vadd.f32 %v1279_v4, %v1562_v25 }
 0x24f   :  { %v1281_v7 = vpop.f32.mrf.mxu1 }
 0x250   :  { %v1152_v8 = vpack.c.bf16 %v793_v6, %v790_v5  ;;  %v1282_v10 = vadd.f32 %v1281_v7, %v1280_v24 }
 0x251   :  { %v1283_v9 = vpop.f32.mrf.mxu1 }
 0x252   :  { %1172 = vst [vmem:[#allocation8 + $0x70] sm:$0xff] %v1152_v8   ;;  %v798_v13 = vadd.f32 %v1282_v10, %v1562_v25 }
 0x253   :  { %v1284_v11 = vpop.f32.mrf.mxu1 }
 0x254   :  { %v1285_v12 = vadd.f32 %v1284_v11, %v1283_v9 }
 0x256   :  { %v801_v14 = vadd.f32 %v1285_v12, %v1562_v25 }
 0x258   :  { %v1157_v15 = vpack.c.bf16 %v801_v14, %v798_v13 }
 0x25a   :  { %1173 = vst [vmem:[#allocation8 + $0x78] sm:$0xff] %v1157_v15  }
 0x25b   :  { %1406 = shalt.err (!%p1403_p5)
}
 0x25c   :  { %975 = dma.vmem_to_hbm [thread:$0]  %s970_s12, 2048, %s1607_s5, [#allocation4], %s1426_s1, %s1426_s1, %s1427_s8  }
 0x25d   :  { %1419 = dma.done.wait [#allocation4], 2048  }
 0x25e   :  { %1420 = vsyncadd [#allocation4], 4294965248 }
 0x25f   :  { %979 = vsyncpa [#allocation3], 1 }
 0x260   :  { %980 = vsyncpa [#allocation6], 1 }
 0x261   :  { %981 = vsyncpa [#allocation4], 1 }

</bundles_post_ra>
